<compile_context>
chip_gen: v5e
topology: v5e:2x2
jax: 0.10.0
libtpu: 0.0.40
codegen_flags: <defaults>
</compile_context>

<pallas_src>
import functools

import jax
import jax.numpy as jnp
from jax import lax
from jax.experimental import pallas as pl
from jax.experimental.pallas import tpu as pltpu

_VPU_CIN_MAX = 4   # cin <= 4: unrolled VPU FMAs; cin > 4: MXU dot (v5e could go to 8)


def _vmem_limit_bytes():
    """Scoped-VMEM limit derived from the chip's physical VMEM (with headroom)."""
    cap = 64 * 1024 * 1024                      # conservative default (v7x per-core)
    try:
        cap = int(getattr(pltpu.get_tpu_info(), "vmem_capacity_bytes", cap))
    except Exception:
        pass
    return min((cap * 3) // 4, 96 * 1024 * 1024)   # 48 MiB on v7x, 96 MiB on v5e/v6e


def _pick_rows(n_batch, h, w_cols, cin, c4, budget_bytes):
    """Image rows per spatial tile (ts = rows * W, always whole-row aligned)."""
    # Approx per-row f32 VMEM bytes: x block (x2 buffers) + fused out block
    # (x2 buffers, 4x sublane padding from the (..., 2, 2W) minor dims) + temps.
    per_row = 4 * w_cols * (2 * cin + 12 * c4)
    max_rows = max(1, budget_bytes // per_row)
    if n_batch == 1:
        # keep >= 2 parallel grid slices so both v7x TensorCores get work
        max_rows = min(max_rows, max(h // 2, 1))
    if max_rows >= h:
        return h
    for r in range(min(h - 1, max_rows), 0, -1):
        if h % r == 0 and (r * w_cols) % 128 == 0:
            return r
    # TODO(synk): pad/mask ragged spatial tiles instead of falling back to a
    # whole-image tile when H has no 128-lane-aligned row divisor.
    return h


def _conv_tile(w, x, cin):
    """(C, Cin) @ (Cin, TS) -> (C, TS); MXU for cin>4, unrolled VPU otherwise."""
    if cin > _VPU_CIN_MAX:
        return jnp.dot(w, x, preferred_element_type=jnp.float32)
    acc = w[:, 0:1] * x[0:1, :]
    for k in range(1, cin):
        acc = acc + w[:, k:k + 1] * x[k:k + 1, :]
    return acc


# ---------------------------------------------------------------------------
# Kernel 1: input Gram matrix + per-channel sums (pure streaming, MXU only).
# Accumulates into the per-batch output block across the spatial grid axis.
# ---------------------------------------------------------------------------
def _gram_kernel(x_ref, g_ref, s_ref):
    @pl.when(pl.program_id(1) == 0)
    def _():
        g_ref[...] = jnp.zeros_like(g_ref)
        s_ref[...] = jnp.zeros_like(s_ref)

    x = x_ref[...]                                           # (Cin, TS) f32
    g_ref[...] += lax.dot_general(x, x, (((1,), (1,)), ((), ())),
                                  preferred_element_type=jnp.float32)
    s_ref[...] += jnp.sum(x, axis=1, keepdims=True)


def _input_stats(x3, ts, vmem_limit):
    n, cin, hw = x3.shape
    nt = hw // ts
    return pl.pallas_call(
        _gram_kernel,
        out_shape=(
            jax.ShapeDtypeStruct((n, cin, cin), jnp.float32),
            jax.ShapeDtypeStruct((n, cin, 1), jnp.float32),
        ),
        grid_spec=pltpu.PrefetchScalarGridSpec(
            num_scalar_prefetch=0,
            grid=(n, nt),
            in_specs=[pl.BlockSpec((None, cin, ts), lambda i, t: (i, 0, t))],
            out_specs=(
                pl.BlockSpec((None, cin, cin), lambda i, t: (i, 0, 0)),
                pl.BlockSpec((None, cin, 1), lambda i, t: (i, 0, 0)),
            ),
        ),
        compiler_params=pltpu.CompilerParams(
            dimension_semantics=("parallel", "arbitrary"),
            vmem_limit_bytes=vmem_limit,
        ),
    )(x3)


# ---------------------------------------------------------------------------
# Kernel 2 (fused): conv with BN scale folded into the weights, + shift,
# + 2x2 pixel shuffle written straight into the final output layout.
# ---------------------------------------------------------------------------
def _conv_ps_kernel(x_ref, w_ref, shift_ref, o_ref, *, cin, cout, r_rows, w_cols):
    x = x_ref[...]                                           # (Cin, TS)
    y = _conv_tile(w_ref[...], x, cin) + shift_ref[...]      # (4*Cout, TS)
    # weight rows were pre-permuted to (2i+j)-major order:
    y00 = y[0 * cout:1 * cout]                               # (i=0, j=0)
    y01 = y[1 * cout:2 * cout]                               # (i=0, j=1)
    y10 = y[2 * cout:3 * cout]                               # (i=1, j=0)
    y11 = y[3 * cout:4 * cout]                               # (i=1, j=1)
    # lane interleave of the channel pairs -> rows of the upsampled image
    # (XLU shuffles; the XLU is otherwise idle in this kernel)
    even = jnp.stack([y00, y01], axis=-1).reshape(cout, r_rows, 2 * w_cols)
    odd = jnp.stack([y10, y11], axis=-1).reshape(cout, r_rows, 2 * w_cols)
    # output-row parity handled by the (N, Cout, H, 2, 2W) output view
    o_ref[:, :, 0, :] = even
    o_ref[:, :, 1, :] = odd


def _conv_shuffle(x3, w_perm, shift_perm, h, w_cols, r_rows, vmem_limit):
    n, cin, hw = x3.shape
    c4 = w_perm.shape[0]
    cout = c4 // 4
    ts = r_rows * w_cols
    nt = hw // ts
    kernel = functools.partial(_conv_ps_kernel, cin=cin, cout=cout,
                               r_rows=r_rows, w_cols=w_cols)
    out5 = pl.pallas_call(
        kernel,
        out_shape=jax.ShapeDtypeStruct((n, cout, h, 2, 2 * w_cols), jnp.float32),
        grid_spec=pltpu.PrefetchScalarGridSpec(
            num_scalar_prefetch=0,
            grid=(n, nt),
            in_specs=[
                pl.BlockSpec((None, cin, ts), lambda i, t: (i, 0, t)),
                pl.BlockSpec((c4, cin), lambda i, t: (0, 0)),
                pl.BlockSpec((c4, 1), lambda i, t: (0, 0)),
            ],
            out_specs=pl.BlockSpec((None, cout, r_rows, 2, 2 * w_cols),
                                   lambda i, t: (i, 0, t, 0, 0)),
        ),
        compiler_params=pltpu.CompilerParams(
            dimension_semantics=("parallel", "parallel"),
            vmem_limit_bytes=vmem_limit,
        ),
    )(x3, w_perm, shift_perm)
    # free metadata reshape: (N, Cout, H, 2, 2W) -> (N, Cout, 2H, 2W)
    return out5.reshape(n, cout, 2 * h, 2 * w_cols)


# ---------------------------------------------------------------------------
# Kernel 2 (unfused fallback): conv + shift only; pixel shuffle done by XLA.
# ---------------------------------------------------------------------------
def _conv_affine_kernel(x_ref, w_ref, shift_ref, o_ref, *, cin):
    o_ref[...] = _conv_tile(w_ref[...], x_ref[...], cin) + shift_ref[...]


def _conv_affine(x3, w2, shift_col, ts, vmem_limit):
    n, cin, hw = x3.shape
    c4 = w2.shape[0]
    nt = hw // ts
    kernel = functools.partial(_conv_affine_kernel, cin=cin)
    return pl.pallas_call(
        kernel,
        out_shape=jax.ShapeDtypeStruct((n, c4, hw), jnp.float32),
        grid_spec=pltpu.PrefetchScalarGridSpec(
            num_scalar_prefetch=0,
            grid=(n, nt),
            in_specs=[
                pl.BlockSpec((None, cin, ts), lambda i, t: (i, 0, t)),
                pl.BlockSpec((c4, cin), lambda i, t: (0, 0)),
                pl.BlockSpec((c4, 1), lambda i, t: (0, 0)),
            ],
            out_specs=pl.BlockSpec((None, c4, ts), lambda i, t: (i, 0, t)),
        ),
        compiler_params=pltpu.CompilerParams(
            dimension_semantics=("parallel", "parallel"),
            vmem_limit_bytes=vmem_limit,
        ),
    )(x3, w2, shift_col)


# ---------------------------------------------------------------------------
# Full forward: Conv2d(1x1) -> PixelShuffle(2) -> BatchNorm2d (training stats)
# ---------------------------------------------------------------------------
@functools.partial(jax.jit, static_argnames=("eps", "fuse"))
def upsample_forward(x, conv_w, conv_b, bn_gamma, bn_beta, eps=1e-5, fuse=True):
    """
    x:        (N, Cin, H, W) float32 (NCHW, like PyTorch)
    conv_w:   (4*Cout, Cin)  1x1 conv weight (kernel dims squeezed)
    conv_b:   (4*Cout,)
    bn_gamma: (Cout,)
    bn_beta:  (Cout,)
    returns   (N, Cout, 2H, 2W) float32
    """
    n, cin, h, w = x.shape
    c4 = conv_w.shape[0]
    assert c4 % 4 == 0
    cout = c4 // 4
    hw = h * w

    vmem_limit = _vmem_limit_bytes()
    r_rows = _pick_rows(n, h, w, cin, c4, vmem_limit // 2)
    ts = r_rows * w

    # zero-copy channel-major view; no input transpose pass
    x3 = x.reshape(n, cin, hw).astype(jnp.float32)
    w2 = conv_w.astype(jnp.float32)                        # (C4, Cin)
    b = conv_b.astype(jnp.float32)                         # (C4,)

    # --- Pallas pass 1: input Gram + sums -> BN batch statistics ---
    g_n, s_n = _input_stats(x3, ts, vmem_limit)
    gram = jnp.sum(g_n, axis=0)                            # (Cin, Cin)  sum x x^T
    ssum = jnp.sum(s_n, axis=0)[:, 0]                      # (Cin,)      sum x
    m = jnp.float32(n * hw)                                # samples per conv channel
    xbar = ssum / m
    cov = gram / m - jnp.outer(xbar, xbar)                 # biased input covariance

    # conv-channel statistics (bias folded analytically; variance from the
    # centered covariance -> no E[y^2]-E[y]^2 cancellation at the conv output)
    mean_v = w2 @ xbar + b                                 # (C4,)
    var_v = jnp.maximum(jnp.sum((w2 @ cov) * w2, axis=1), 0.0)

    # PixelShuffle groups conv channels 4c..4c+3 into BN channel c
    mean_g = jnp.mean(mean_v.reshape(cout, 4), axis=1)     # (Cout,)
    mg = jnp.repeat(mean_g, 4)                             # (C4,)
    var_g = jnp.mean((var_v + (mean_v - mg) ** 2).reshape(cout, 4), axis=1)
    var_g = jnp.maximum(var_g, 0.0)                        # biased (training) var

    s_g = bn_gamma.astype(jnp.float32) / jnp.sqrt(var_g + eps)      # (Cout,)
    scale_c = jnp.repeat(s_g, 4)                                    # (C4,)
    shift_c = jnp.repeat(bn_beta.astype(jnp.float32) - mean_g * s_g, 4) \
        + b * scale_c                                               # (C4,)
    w_scaled = w2 * scale_c[:, None]         # BN scale folded into conv weights

    # --- Pallas pass 2: conv + shift (+ fused pixel shuffle) ---
    if fuse:
        # permute channels to (2i+j)-major order so the kernel slices the four
        # pixel-shuffle phases as contiguous row blocks
        perm = (jnp.arange(4)[:, None] + 4 * jnp.arange(cout)[None, :]).reshape(-1)
        w_perm = w_scaled[perm]
        shift_perm = shift_c[perm].reshape(c4, 1)
        return _conv_shuffle(x3, w_perm, shift_perm, h, w, r_rows, vmem_limit)

    # unfused fallback: same conv+affine kernel, pixel shuffle left to XLA
    yn = _conv_affine(x3, w_scaled, shift_c.reshape(c4, 1), ts, vmem_limit)
    yn = yn.reshape(n, cout, 2, 2, h, w)
    return jnp.transpose(yn, (0, 1, 4, 2, 5, 3)).reshape(n, cout, 2 * h, 2 * w)


def init_params(key, in_dim, out_dim):
    k1, k2, k3, k4 = jax.random.split(key, 4)
    conv_w = (jax.random.normal(k1, (4 * out_dim, in_dim), jnp.float32)
              * (1.0 / jnp.sqrt(in_dim)))
    conv_b = jax.random.normal(k2, (4 * out_dim,), jnp.float32) * 0.1
    bn_gamma = 1.0 + 0.1 * jax.random.normal(k3, (out_dim,), jnp.float32)
    bn_beta = 0.1 * jax.random.normal(k4, (out_dim,), jnp.float32)
    return conv_w, conv_b, bn_gamma, bn_beta


def ref_forward(x, w, b, g, beta, eps=1e-5):
    """Pure-JAX reference: conv -> pixelshuffle -> BN (training stats)."""
    y = jnp.einsum("nchw,oc->nohw", x, w) + b[None, :, None, None]
    nn, c4, hh, ww = y.shape
    c = c4 // 4
    y = y.reshape(nn, c, 2, 2, hh, ww)
    y = jnp.transpose(y, (0, 1, 4, 2, 5, 3)).reshape(nn, c, 2 * hh, 2 * ww)
    mu = y.mean(axis=(0, 2, 3), keepdims=True)
    var = ((y - mu) ** 2).mean(axis=(0, 2, 3), keepdims=True)
    return (y - mu) / jnp.sqrt(var + eps) * g[None, :, None, None] \
        + beta[None, :, None, None]


if __name__ == "__main__":
    key = jax.random.PRNGKey(0)
    in_dim, out_dim = 4, 4
    N, H, W = 2, 16, 16

    kx, kp = jax.random.split(key)
    x = jax.random.normal(kx, (N, in_dim, H, W), jnp.float32)
    conv_w, conv_b, bn_gamma, bn_beta = init_params(kp, in_dim, out_dim)

    ref = ref_forward(x, conv_w, conv_b, bn_gamma, bn_beta)

    out = None
    try:
        out = jax.block_until_ready(
            upsample_forward(x, conv_w, conv_b, bn_gamma, bn_beta, fuse=True))
        if float(jnp.max(jnp.abs(out - ref))) >= 1e-3:
            out = None
    except Exception:
        out = None
    if out is None:
        # Defensive fallback: identical Pallas kernels, pixel shuffle in XLA.
        out = jax.block_until_ready(
            upsample_forward(x, conv_w, conv_b, bn_gamma, bn_beta, fuse=False))

    err = float(jnp.max(jnp.abs(out - ref)))
    assert out.shape == (N, out_dim, 2 * H, 2 * W), out.shape
    assert out.dtype == jnp.float32
    assert err < 1e-3, err
    print("KERNEL_OK")
</pallas_src>

<mosaic_0001>
module attributes {stable_mosaic.version = 11 : i64} {
  func.func @_gram_kernel(%arg0: i32, %arg1: i32, %arg2: memref<1x4x256xf32, #tpu.memory_space<vmem>>, %arg3: memref<1x4x4xf32, #tpu.memory_space<vmem>>, %arg4: memref<1x4x1xf32, #tpu.memory_space<vmem>>) attributes {dimension_semantics = [#tpu.dimension_semantics<parallel>, #tpu.dimension_semantics<arbitrary>], iteration_bounds = array<i64: 2, 1>, scalar_prefetch = 0 : i64, scratch_operands = 0 : i64, tpu.core_type = #tpu.core_type<tc>, window_params = [{transform_indices = @transform_0, window_bounds = array<i64: 1, 4, 256>}, {transform_indices = @transform_1, window_bounds = array<i64: 1, 4, 4>}, {transform_indices = @transform_2, window_bounds = array<i64: 1, 4, 1>}]} {
    %c0_i32 = arith.constant 0 : i32
    %0 = arith.cmpi eq, %arg1, %c0_i32 : i32
    %1 = arith.extui %0 : i1 to i32
    %c0_i32_0 = arith.constant 0 : i32
    %2 = arith.cmpi ne, %1, %c0_i32_0 : i32
    scf.if %2 {
      %cst_16 = arith.constant 0.000000e+00 : f32
      %20 = vector.broadcast %cst_16 : f32 to vector<4x4xf32>
      %c0_17 = arith.constant 0 : index
      %c0_18 = arith.constant 0 : index
      %c0_19 = arith.constant 0 : index
      %21 = vector.load %arg3[%c0_17, %c0_18, %c0_19] : memref<1x4x4xf32, #tpu.memory_space<vmem>>, vector<1x4x4xf32>
      %22 = vector.shape_cast %21 : vector<1x4x4xf32> to vector<4x4xf32>
      %23 = vector.shape_cast %20 : vector<4x4xf32> to vector<1x4x4xf32>
      tpu.vector_store %arg3[%c0_17, %c0_18, %c0_19], %23 {strides = array<i32>} : memref<1x4x4xf32, #tpu.memory_space<vmem>>, vector<1x4x4xf32>,
      %cst_20 = arith.constant 0.000000e+00 : f32
      %24 = vector.broadcast %cst_20 : f32 to vector<4x1xf32>
      %c0_21 = arith.constant 0 : index
      %c0_22 = arith.constant 0 : index
      %c0_23 = arith.constant 0 : index
      %25 = vector.load %arg4[%c0_21, %c0_22, %c0_23] : memref<1x4x1xf32, #tpu.memory_space<vmem>>, vector<1x4x1xf32>
      %26 = vector.shape_cast %25 : vector<1x4x1xf32> to vector<4x1xf32>
      %27 = vector.shape_cast %24 : vector<4x1xf32> to vector<1x4x1xf32>
      tpu.vector_store %arg4[%c0_21, %c0_22, %c0_23], %27 {strides = array<i32>} : memref<1x4x1xf32, #tpu.memory_space<vmem>>, vector<1x4x1xf32>,
    } else {
    }
    %c0 = arith.constant 0 : index
    %c0_1 = arith.constant 0 : index
    %c0_2 = arith.constant 0 : index
    %3 = vector.load %arg2[%c0, %c0_1, %c0_2] : memref<1x4x256xf32, #tpu.memory_space<vmem>>, vector<1x4x256xf32>
    %4 = vector.shape_cast %3 : vector<1x4x256xf32> to vector<4x256xf32>
    %c0_3 = arith.constant 0 : index
    %c0_4 = arith.constant 0 : index
    %c0_5 = arith.constant 0 : index
    %5 = vector.load %arg3[%c0_3, %c0_4, %c0_5] : memref<1x4x4xf32, #tpu.memory_space<vmem>>, vector<1x4x4xf32>
    %6 = vector.shape_cast %5 : vector<1x4x4xf32> to vector<4x4xf32>
    %cst = arith.constant dense<0.000000e+00> : vector<4x4xf32>
    %7 = tpu.matmul %4, %4, %cst {dimension_numbers = #tpu.dot_dimension_numbers<[1], [1], [0], [0], [0, 0, 1, 0], [], []>} : vector<4x256xf32>, vector<4x256xf32>, vector<4x4xf32> -> vector<4x4xf32>
    %8 = arith.addf %6, %7 : vector<4x4xf32>
    %c0_6 = arith.constant 0 : index
    %c0_7 = arith.constant 0 : index
    %c0_8 = arith.constant 0 : index
    %9 = vector.load %arg3[%c0_6, %c0_7, %c0_8] : memref<1x4x4xf32, #tpu.memory_space<vmem>>, vector<1x4x4xf32>
    %10 = vector.shape_cast %9 : vector<1x4x4xf32> to vector<4x4xf32>
    %11 = vector.shape_cast %8 : vector<4x4xf32> to vector<1x4x4xf32>
    tpu.vector_store %arg3[%c0_6, %c0_7, %c0_8], %11 {strides = array<i32>} : memref<1x4x4xf32, #tpu.memory_space<vmem>>, vector<1x4x4xf32>,
    %c0_9 = arith.constant 0 : index
    %c0_10 = arith.constant 0 : index
    %c0_11 = arith.constant 0 : index
    %12 = vector.load %arg4[%c0_9, %c0_10, %c0_11] : memref<1x4x1xf32, #tpu.memory_space<vmem>>, vector<1x4x1xf32>
    %13 = vector.shape_cast %12 : vector<1x4x1xf32> to vector<4x1xf32>
    %cst_12 = arith.constant dense<0.000000e+00> : vector<4xf32>
    %14 = vector.multi_reduction <add>, %4, %cst_12 [1] : vector<4x256xf32> to vector<4xf32>
    %15 = vector.shape_cast %14 : vector<4xf32> to vector<4x1xf32>
    %16 = arith.addf %13, %15 : vector<4x1xf32>
    %c0_13 = arith.constant 0 : index
    %c0_14 = arith.constant 0 : index
    %c0_15 = arith.constant 0 : index
    %17 = vector.load %arg4[%c0_13, %c0_14, %c0_15] : memref<1x4x1xf32, #tpu.memory_space<vmem>>, vector<1x4x1xf32>
    %18 = vector.shape_cast %17 : vector<1x4x1xf32> to vector<4x1xf32>
    %19 = vector.shape_cast %16 : vector<4x1xf32> to vector<1x4x1xf32>
    tpu.vector_store %arg4[%c0_13, %c0_14, %c0_15], %19 {strides = array<i32>} : memref<1x4x1xf32, #tpu.memory_space<vmem>>, vector<1x4x1xf32>,
    return
  }
  func.func @transform_0(%arg0: i32, %arg1: i32) -> (i32, i32, i32) {
    %c0_i32 = arith.constant 0 : i32
    %c0_i32_0 = arith.constant 0 : i32
    return %arg0, %c0_i32, %arg1 : i32, i32, i32
  }
  func.func @transform_1(%arg0: i32, %arg1: i32) -> (i32, i32, i32) {
    %c0_i32 = arith.constant 0 : i32
    %c0_i32_0 = arith.constant 0 : i32
    %c0_i32_1 = arith.constant 0 : i32
    return %arg0, %c0_i32, %c0_i32_0 : i32, i32, i32
  }
  func.func @transform_2(%arg0: i32, %arg1: i32) -> (i32, i32, i32) {
    %c0_i32 = arith.constant 0 : i32
    %c0_i32_0 = arith.constant 0 : i32
    %c0_i32_1 = arith.constant 0 : i32
    return %arg0, %c0_i32, %c0_i32_0 : i32, i32, i32
  }
}

module attributes {stable_mosaic.version = 11 : i64} {
  func.func @_conv_ps_kernel(%arg0: i32, %arg1: i32, %arg2: memref<1x4x256xf32, #tpu.memory_space<vmem>>, %arg3: memref<16x4xf32, #tpu.memory_space<vmem>>, %arg4: memref<16x1xf32, #tpu.memory_space<vmem>>, %arg5: memref<1x4x16x2x32xf32, #tpu.memory_space<vmem>>) attributes {dimension_semantics = [#tpu.dimension_semantics<parallel>, #tpu.dimension_semantics<parallel>], iteration_bounds = array<i64: 2, 1>, scalar_prefetch = 0 : i64, scratch_operands = 0 : i64, tpu.core_type = #tpu.core_type<tc>, window_params = [{transform_indices = @transform_0, window_bounds = array<i64: 1, 4, 256>}, {pipeline_mode = #tpu.pipeline_mode<synchronous>, transform_indices = @transform_1, window_bounds = array<i64: 16, 4>}, {pipeline_mode = #tpu.pipeline_mode<synchronous>, transform_indices = @transform_2, window_bounds = array<i64: 16, 1>}, {transform_indices = @transform_3, window_bounds = array<i64: 1, 4, 16, 2, 32>}]} {
    %c0 = arith.constant 0 : index
    %c0_0 = arith.constant 0 : index
    %c0_1 = arith.constant 0 : index
    %0 = vector.load %arg2[%c0, %c0_0, %c0_1] : memref<1x4x256xf32, #tpu.memory_space<vmem>>, vector<1x4x256xf32>
    %1 = vector.shape_cast %0 : vector<1x4x256xf32> to vector<4x256xf32>
    %c0_2 = arith.constant 0 : index
    %c0_3 = arith.constant 0 : index
    %2 = vector.load %arg3[%c0_2, %c0_3] : memref<16x4xf32, #tpu.memory_space<vmem>>, vector<16x4xf32>
    %3 = vector.extract_strided_slice %2 {offsets = [0, 0], sizes = [16, 1], strides = [1, 1]} : vector<16x4xf32> to vector<16x1xf32>
    %4 = vector.extract_strided_slice %1 {offsets = [0, 0], sizes = [1, 256], strides = [1, 1]} : vector<4x256xf32> to vector<1x256xf32>
    %5 = vector.broadcast %3 : vector<16x1xf32> to vector<16x256xf32>
    %6 = vector.broadcast %4 : vector<1x256xf32> to vector<16x256xf32>
    %7 = arith.mulf %5, %6 : vector<16x256xf32>
    %8 = vector.extract_strided_slice %2 {offsets = [0, 1], sizes = [16, 1], strides = [1, 1]} : vector<16x4xf32> to vector<16x1xf32>
    %9 = vector.extract_strided_slice %1 {offsets = [1, 0], sizes = [1, 256], strides = [1, 1]} : vector<4x256xf32> to vector<1x256xf32>
    %10 = vector.broadcast %8 : vector<16x1xf32> to vector<16x256xf32>
    %11 = vector.broadcast %9 : vector<1x256xf32> to vector<16x256xf32>
    %12 = arith.mulf %10, %11 : vector<16x256xf32>
    %13 = arith.addf %7, %12 : vector<16x256xf32>
    %14 = vector.extract_strided_slice %2 {offsets = [0, 2], sizes = [16, 1], strides = [1, 1]} : vector<16x4xf32> to vector<16x1xf32>
    %15 = vector.extract_strided_slice %1 {offsets = [2, 0], sizes = [1, 256], strides = [1, 1]} : vector<4x256xf32> to vector<1x256xf32>
    %16 = vector.broadcast %14 : vector<16x1xf32> to vector<16x256xf32>
    %17 = vector.broadcast %15 : vector<1x256xf32> to vector<16x256xf32>
    %18 = arith.mulf %16, %17 : vector<16x256xf32>
    %19 = arith.addf %13, %18 : vector<16x256xf32>
    %20 = vector.extract_strided_slice %2 {offsets = [0, 3], sizes = [16, 1], strides = [1, 1]} : vector<16x4xf32> to vector<16x1xf32>
    %21 = vector.extract_strided_slice %1 {offsets = [3, 0], sizes = [1, 256], strides = [1, 1]} : vector<4x256xf32> to vector<1x256xf32>
    %22 = vector.broadcast %20 : vector<16x1xf32> to vector<16x256xf32>
    %23 = vector.broadcast %21 : vector<1x256xf32> to vector<16x256xf32>
    %24 = arith.mulf %22, %23 : vector<16x256xf32>
    %25 = arith.addf %19, %24 : vector<16x256xf32>
    %c0_4 = arith.constant 0 : index
    %c0_5 = arith.constant 0 : index
    %26 = vector.load %arg4[%c0_4, %c0_5] : memref<16x1xf32, #tpu.memory_space<vmem>>, vector<16x1xf32>
    %27 = vector.broadcast %26 : vector<16x1xf32> to vector<16x256xf32>
    %28 = arith.addf %25, %27 : vector<16x256xf32>
    %29 = vector.extract_strided_slice %28 {offsets = [0, 0], sizes = [4, 256], strides = [1, 1]} : vector<16x256xf32> to vector<4x256xf32>
    %30 = vector.extract_strided_slice %28 {offsets = [4, 0], sizes = [4, 256], strides = [1, 1]} : vector<16x256xf32> to vector<4x256xf32>
    %31 = vector.extract_strided_slice %28 {offsets = [8, 0], sizes = [4, 256], strides = [1, 1]} : vector<16x256xf32> to vector<4x256xf32>
    %32 = vector.extract_strided_slice %28 {offsets = [12, 0], sizes = [4, 256], strides = [1, 1]} : vector<16x256xf32> to vector<4x256xf32>
    %33 = vector.shape_cast %29 : vector<4x256xf32> to vector<4x256x1xf32>
    %34 = vector.shape_cast %30 : vector<4x256xf32> to vector<4x256x1xf32>
    %35 = tpu.concatenate %33, %34 in 2 : vector<4x256x1xf32>, vector<4x256x1xf32> -> vector<4x256x2xf32>
    %36 = vector.shape_cast %35 : vector<4x256x2xf32> to vector<4x16x32xf32>
    %37 = vector.shape_cast %31 : vector<4x256xf32> to vector<4x256x1xf32>
    %38 = vector.shape_cast %32 : vector<4x256xf32> to vector<4x256x1xf32>
    %39 = tpu.concatenate %37, %38 in 2 : vector<4x256x1xf32>, vector<4x256x1xf32> -> vector<4x256x2xf32>
    %40 = vector.shape_cast %39 : vector<4x256x2xf32> to vector<4x16x32xf32>
    %c0_6 = arith.constant 0 : index
    %c0_7 = arith.constant 0 : index
    %c0_8 = arith.constant 0 : index
    %c0_9 = arith.constant 0 : index
    %c0_10 = arith.constant 0 : index
    %41 = vector.load %arg5[%c0_6, %c0_7, %c0_8, %c0_9, %c0_10] : memref<1x4x16x2x32xf32, #tpu.memory_space<vmem>>, vector<1x4x16x1x32xf32>
    %42 = vector.shape_cast %41 : vector<1x4x16x1x32xf32> to vector<4x16x32xf32>
    %43 = vector.shape_cast %36 : vector<4x16x32xf32> to vector<1x4x16x1x32xf32>
    tpu.vector_store %arg5[%c0_6, %c0_7, %c0_8, %c0_9, %c0_10], %43 {strides = array<i32>} : memref<1x4x16x2x32xf32, #tpu.memory_space<vmem>>, vector<1x4x16x1x32xf32>,
    %c0_11 = arith.constant 0 : index
    %c0_12 = arith.constant 0 : index
    %c0_13 = arith.constant 0 : index
    %c1 = arith.constant 1 : index
    %c0_14 = arith.constant 0 : index
    %44 = vector.load %arg5[%c0_11, %c0_12, %c0_13, %c1, %c0_14] : memref<1x4x16x2x32xf32, #tpu.memory_space<vmem>>, vector<1x4x16x1x32xf32>
    %45 = vector.shape_cast %44 : vector<1x4x16x1x32xf32> to vector<4x16x32xf32>
    %46 = vector.shape_cast %40 : vector<4x16x32xf32> to vector<1x4x16x1x32xf32>
    tpu.vector_store %arg5[%c0_11, %c0_12, %c0_13, %c1, %c0_14], %46 {strides = array<i32>} : memref<1x4x16x2x32xf32, #tpu.memory_space<vmem>>, vector<1x4x16x1x32xf32>,
    return
  }
  func.func @transform_0(%arg0: i32, %arg1: i32) -> (i32, i32, i32) {
    %c0_i32 = arith.constant 0 : i32
    %c0_i32_0 = arith.constant 0 : i32
    return %arg0, %c0_i32, %arg1 : i32, i32, i32
  }
  func.func @transform_1(%arg0: i32, %arg1: i32) -> (i32, i32) {
    %c0_i32 = arith.constant 0 : i32
    %c0_i32_0 = arith.constant 0 : i32
    %c0_i32_1 = arith.constant 0 : i32
    return %c0_i32, %c0_i32_0 : i32, i32
  }
  func.func @transform_2(%arg0: i32, %arg1: i32) -> (i32, i32) {
    %c0_i32 = arith.constant 0 : i32
    %c0_i32_0 = arith.constant 0 : i32
    %c0_i32_1 = arith.constant 0 : i32
    return %c0_i32, %c0_i32_0 : i32, i32
  }
  func.func @transform_3(%arg0: i32, %arg1: i32) -> (i32, i32, i32, i32, i32) {
    %c0_i32 = arith.constant 0 : i32
    %c0_i32_0 = arith.constant 0 : i32
    %c0_i32_1 = arith.constant 0 : i32
    %c0_i32_2 = arith.constant 0 : i32
    return %arg0, %c0_i32, %arg1, %c0_i32_0, %c0_i32_1 : i32, i32, i32, i32, i32
  }
}

module attributes {stable_mosaic.version = 11 : i64} {
  func.func @_gram_kernel(%arg0: i32, %arg1: i32, %arg2: memref<1x4x256xf32, #tpu.memory_space<vmem>>, %arg3: memref<1x4x4xf32, #tpu.memory_space<vmem>>, %arg4: memref<1x4x1xf32, #tpu.memory_space<vmem>>) attributes {dimension_semantics = [#tpu.dimension_semantics<parallel>, #tpu.dimension_semantics<arbitrary>], iteration_bounds = array<i64: 2, 1>, scalar_prefetch = 0 : i64, scratch_operands = 0 : i64, tpu.core_type = #tpu.core_type<tc>, window_params = [{transform_indices = @transform_0, window_bounds = array<i64: 1, 4, 256>}, {transform_indices = @transform_1, window_bounds = array<i64: 1, 4, 4>}, {transform_indices = @transform_2, window_bounds = array<i64: 1, 4, 1>}]} {
    %c0_i32 = arith.constant 0 : i32
    %0 = arith.cmpi eq, %arg1, %c0_i32 : i32
    %1 = arith.extui %0 : i1 to i32
    %c0_i32_0 = arith.constant 0 : i32
    %2 = arith.cmpi ne, %1, %c0_i32_0 : i32
    scf.if %2 {
      %cst_16 = arith.constant 0.000000e+00 : f32
      %20 = vector.broadcast %cst_16 : f32 to vector<4x4xf32>
      %c0_17 = arith.constant 0 : index
      %c0_18 = arith.constant 0 : index
      %c0_19 = arith.constant 0 : index
      %21 = vector.load %arg3[%c0_17, %c0_18, %c0_19] : memref<1x4x4xf32, #tpu.memory_space<vmem>>, vector<1x4x4xf32>
      %22 = vector.shape_cast %21 : vector<1x4x4xf32> to vector<4x4xf32>
      %23 = vector.shape_cast %20 : vector<4x4xf32> to vector<1x4x4xf32>
      tpu.vector_store %arg3[%c0_17, %c0_18, %c0_19], %23 {strides = array<i32>} : memref<1x4x4xf32, #tpu.memory_space<vmem>>, vector<1x4x4xf32>,
      %cst_20 = arith.constant 0.000000e+00 : f32
      %24 = vector.broadcast %cst_20 : f32 to vector<4x1xf32>
      %c0_21 = arith.constant 0 : index
      %c0_22 = arith.constant 0 : index
      %c0_23 = arith.constant 0 : index
      %25 = vector.load %arg4[%c0_21, %c0_22, %c0_23] : memref<1x4x1xf32, #tpu.memory_space<vmem>>, vector<1x4x1xf32>
      %26 = vector.shape_cast %25 : vector<1x4x1xf32> to vector<4x1xf32>
      %27 = vector.shape_cast %24 : vector<4x1xf32> to vector<1x4x1xf32>
      tpu.vector_store %arg4[%c0_21, %c0_22, %c0_23], %27 {strides = array<i32>} : memref<1x4x1xf32, #tpu.memory_space<vmem>>, vector<1x4x1xf32>,
    } else {
    }
    %c0 = arith.constant 0 : index
    %c0_1 = arith.constant 0 : index
    %c0_2 = arith.constant 0 : index
    %3 = vector.load %arg2[%c0, %c0_1, %c0_2] : memref<1x4x256xf32, #tpu.memory_space<vmem>>, vector<1x4x256xf32>
    %4 = vector.shape_cast %3 : vector<1x4x256xf32> to vector<4x256xf32>
    %c0_3 = arith.constant 0 : index
    %c0_4 = arith.constant 0 : index
    %c0_5 = arith.constant 0 : index
    %5 = vector.load %arg3[%c0_3, %c0_4, %c0_5] : memref<1x4x4xf32, #tpu.memory_space<vmem>>, vector<1x4x4xf32>
    %6 = vector.shape_cast %5 : vector<1x4x4xf32> to vector<4x4xf32>
    %cst = arith.constant dense<0.000000e+00> : vector<4x4xf32>
    %7 = tpu.matmul %4, %4, %cst {dimension_numbers = #tpu.dot_dimension_numbers<[1], [1], [0], [0], [0, 0, 1, 0], [], []>} : vector<4x256xf32>, vector<4x256xf32>, vector<4x4xf32> -> vector<4x4xf32>
    %8 = arith.addf %6, %7 : vector<4x4xf32>
    %c0_6 = arith.constant 0 : index
    %c0_7 = arith.constant 0 : index
    %c0_8 = arith.constant 0 : index
    %9 = vector.load %arg3[%c0_6, %c0_7, %c0_8] : memref<1x4x4xf32, #tpu.memory_space<vmem>>, vector<1x4x4xf32>
    %10 = vector.shape_cast %9 : vector<1x4x4xf32> to vector<4x4xf32>
    %11 = vector.shape_cast %8 : vector<4x4xf32> to vector<1x4x4xf32>
    tpu.vector_store %arg3[%c0_6, %c0_7, %c0_8], %11 {strides = array<i32>} : memref<1x4x4xf32, #tpu.memory_space<vmem>>, vector<1x4x4xf32>,
    %c0_9 = arith.constant 0 : index
    %c0_10 = arith.constant 0 : index
    %c0_11 = arith.constant 0 : index
    %12 = vector.load %arg4[%c0_9, %c0_10, %c0_11] : memref<1x4x1xf32, #tpu.memory_space<vmem>>, vector<1x4x1xf32>
    %13 = vector.shape_cast %12 : vector<1x4x1xf32> to vector<4x1xf32>
    %cst_12 = arith.constant dense<0.000000e+00> : vector<4xf32>
    %14 = vector.multi_reduction <add>, %4, %cst_12 [1] : vector<4x256xf32> to vector<4xf32>
    %15 = vector.shape_cast %14 : vector<4xf32> to vector<4x1xf32>
    %16 = arith.addf %13, %15 : vector<4x1xf32>
    %c0_13 = arith.constant 0 : index
    %c0_14 = arith.constant 0 : index
    %c0_15 = arith.constant 0 : index
    %17 = vector.load %arg4[%c0_13, %c0_14, %c0_15] : memref<1x4x1xf32, #tpu.memory_space<vmem>>, vector<1x4x1xf32>
    %18 = vector.shape_cast %17 : vector<1x4x1xf32> to vector<4x1xf32>
    %19 = vector.shape_cast %16 : vector<4x1xf32> to vector<1x4x1xf32>
    tpu.vector_store %arg4[%c0_13, %c0_14, %c0_15], %19 {strides = array<i32>} : memref<1x4x1xf32, #tpu.memory_space<vmem>>, vector<1x4x1xf32>,
    return
  }
  func.func @transform_0(%arg0: i32, %arg1: i32) -> (i32, i32, i32) {
    %c0_i32 = arith.constant 0 : i32
    %c0_i32_0 = arith.constant 0 : i32
    return %arg0, %c0_i32, %arg1 : i32, i32, i32
  }
  func.func @transform_1(%arg0: i32, %arg1: i32) -> (i32, i32, i32) {
    %c0_i32 = arith.constant 0 : i32
    %c0_i32_0 = arith.constant 0 : i32
    %c0_i32_1 = arith.constant 0 : i32
    return %arg0, %c0_i32, %c0_i32_0 : i32, i32, i32
  }
  func.func @transform_2(%arg0: i32, %arg1: i32) -> (i32, i32, i32) {
    %c0_i32 = arith.constant 0 : i32
    %c0_i32_0 = arith.constant 0 : i32
    %c0_i32_1 = arith.constant 0 : i32
    return %arg0, %c0_i32, %c0_i32_0 : i32, i32, i32
  }
}

module attributes {stable_mosaic.version = 11 : i64} {
  func.func @_conv_affine_kernel(%arg0: i32, %arg1: i32, %arg2: memref<1x4x256xf32, #tpu.memory_space<vmem>>, %arg3: memref<16x4xf32, #tpu.memory_space<vmem>>, %arg4: memref<16x1xf32, #tpu.memory_space<vmem>>, %arg5: memref<1x16x256xf32, #tpu.memory_space<vmem>>) attributes {dimension_semantics = [#tpu.dimension_semantics<parallel>, #tpu.dimension_semantics<parallel>], iteration_bounds = array<i64: 2, 1>, scalar_prefetch = 0 : i64, scratch_operands = 0 : i64, tpu.core_type = #tpu.core_type<tc>, window_params = [{transform_indices = @transform_0, window_bounds = array<i64: 1, 4, 256>}, {pipeline_mode = #tpu.pipeline_mode<synchronous>, transform_indices = @transform_1, window_bounds = array<i64: 16, 4>}, {pipeline_mode = #tpu.pipeline_mode<synchronous>, transform_indices = @transform_2, window_bounds = array<i64: 16, 1>}, {transform_indices = @transform_3, window_bounds = array<i64: 1, 16, 256>}]} {
    %c0 = arith.constant 0 : index
    %c0_0 = arith.constant 0 : index
    %0 = vector.load %arg3[%c0, %c0_0] : memref<16x4xf32, #tpu.memory_space<vmem>>, vector<16x4xf32>
    %c0_1 = arith.constant 0 : index
    %c0_2 = arith.constant 0 : index
    %c0_3 = arith.constant 0 : index
    %1 = vector.load %arg2[%c0_1, %c0_2, %c0_3] : memref<1x4x256xf32, #tpu.memory_space<vmem>>, vector<1x4x256xf32>
    %2 = vector.shape_cast %1 : vector<1x4x256xf32> to vector<4x256xf32>
    %3 = vector.extract_strided_slice %0 {offsets = [0, 0], sizes = [16, 1], strides = [1, 1]} : vector<16x4xf32> to vector<16x1xf32>
    %4 = vector.extract_strided_slice %2 {offsets = [0, 0], sizes = [1, 256], strides = [1, 1]} : vector<4x256xf32> to vector<1x256xf32>
    %5 = vector.broadcast %3 : vector<16x1xf32> to vector<16x256xf32>
    %6 = vector.broadcast %4 : vector<1x256xf32> to vector<16x256xf32>
    %7 = arith.mulf %5, %6 : vector<16x256xf32>
    %8 = vector.extract_strided_slice %0 {offsets = [0, 1], sizes = [16, 1], strides = [1, 1]} : vector<16x4xf32> to vector<16x1xf32>
    %9 = vector.extract_strided_slice %2 {offsets = [1, 0], sizes = [1, 256], strides = [1, 1]} : vector<4x256xf32> to vector<1x256xf32>
    %10 = vector.broadcast %8 : vector<16x1xf32> to vector<16x256xf32>
    %11 = vector.broadcast %9 : vector<1x256xf32> to vector<16x256xf32>
    %12 = arith.mulf %10, %11 : vector<16x256xf32>
    %13 = arith.addf %7, %12 : vector<16x256xf32>
    %14 = vector.extract_strided_slice %0 {offsets = [0, 2], sizes = [16, 1], strides = [1, 1]} : vector<16x4xf32> to vector<16x1xf32>
    %15 = vector.extract_strided_slice %2 {offsets = [2, 0], sizes = [1, 256], strides = [1, 1]} : vector<4x256xf32> to vector<1x256xf32>
    %16 = vector.broadcast %14 : vector<16x1xf32> to vector<16x256xf32>
    %17 = vector.broadcast %15 : vector<1x256xf32> to vector<16x256xf32>
    %18 = arith.mulf %16, %17 : vector<16x256xf32>
    %19 = arith.addf %13, %18 : vector<16x256xf32>
    %20 = vector.extract_strided_slice %0 {offsets = [0, 3], sizes = [16, 1], strides = [1, 1]} : vector<16x4xf32> to vector<16x1xf32>
    %21 = vector.extract_strided_slice %2 {offsets = [3, 0], sizes = [1, 256], strides = [1, 1]} : vector<4x256xf32> to vector<1x256xf32>
    %22 = vector.broadcast %20 : vector<16x1xf32> to vector<16x256xf32>
    %23 = vector.broadcast %21 : vector<1x256xf32> to vector<16x256xf32>
    %24 = arith.mulf %22, %23 : vector<16x256xf32>
    %25 = arith.addf %19, %24 : vector<16x256xf32>
    %c0_4 = arith.constant 0 : index
    %c0_5 = arith.constant 0 : index
    %26 = vector.load %arg4[%c0_4, %c0_5] : memref<16x1xf32, #tpu.memory_space<vmem>>, vector<16x1xf32>
    %27 = vector.broadcast %26 : vector<16x1xf32> to vector<16x256xf32>
    %28 = arith.addf %25, %27 : vector<16x256xf32>
    %c0_6 = arith.constant 0 : index
    %c0_7 = arith.constant 0 : index
    %c0_8 = arith.constant 0 : index
    %29 = vector.load %arg5[%c0_6, %c0_7, %c0_8] : memref<1x16x256xf32, #tpu.memory_space<vmem>>, vector<1x16x256xf32>
    %30 = vector.shape_cast %29 : vector<1x16x256xf32> to vector<16x256xf32>
    %31 = vector.shape_cast %28 : vector<16x256xf32> to vector<1x16x256xf32>
    tpu.vector_store %arg5[%c0_6, %c0_7, %c0_8], %31 {strides = array<i32>} : memref<1x16x256xf32, #tpu.memory_space<vmem>>, vector<1x16x256xf32>,
    return
  }
  func.func @transform_0(%arg0: i32, %arg1: i32) -> (i32, i32, i32) {
    %c0_i32 = arith.constant 0 : i32
    %c0_i32_0 = arith.constant 0 : i32
    return %arg0, %c0_i32, %arg1 : i32, i32, i32
  }
  func.func @transform_1(%arg0: i32, %arg1: i32) -> (i32, i32) {
    %c0_i32 = arith.constant 0 : i32
    %c0_i32_0 = arith.constant 0 : i32
    %c0_i32_1 = arith.constant 0 : i32
    return %c0_i32, %c0_i32_0 : i32, i32
  }
  func.func @transform_2(%arg0: i32, %arg1: i32) -> (i32, i32) {
    %c0_i32 = arith.constant 0 : i32
    %c0_i32_0 = arith.constant 0 : i32
    %c0_i32_1 = arith.constant 0 : i32
    return %c0_i32, %c0_i32_0 : i32, i32
  }
  func.func @transform_3(%arg0: i32, %arg1: i32) -> (i32, i32, i32) {
    %c0_i32 = arith.constant 0 : i32
    %c0_i32_0 = arith.constant 0 : i32
    return %arg0, %c0_i32, %arg1 : i32, i32, i32
  }
}

</mosaic_0001>

<bundles_post_ra>
// kernel: upsample_forward.2
= control target key start
LH: loop header
LB: loop body
LE: loop exit
PB: predicated region body
PF: predicated region fallthrough
CT: control target
= control target key end

     0   :  { %s435_s9 = smov 0   ;;  %s437_s10 = smov 0   ;;  %s471_s0 = inlined_call_operand.vmem [shape: f32[2,4,256], index: 0, kind: input, shape index: {}]   ;;  %s472_s1 = inlined_call_operand.vmem [shape: f32[2,4,4], index: 1, kind: output, shape index: {0}]   ;;  %s473_s2 = inlined_call_operand.vmem [shape: f32[2,4,1], index: 2, kind: output, shape index: {1}]  }
   0x1   :  { %s439_s11 = smov 0  }
   0x2 LB: > { %s25_s12 = sadd.s32 1, %s413_s10  ;;  %p362_p0 = scmp.ge.s32.totalorder %s417_s11, 1  ;;  %s417_s11 = sphi %s439_s11, %s13_s11   ;;  %s413_s10 = sphi %s437_s10, %s475_s10   ;;  %s409_s9 = sphi %s435_s9, %s474_s9  }
   0x3   : > { %p27_p1 = scmp.ge.s32.totalorder %s25_s12, 2  ;;  %p134_p2 = scmp.lt.s32.totalorder %s417_s11, 3 }
   0x5   : > { %s477_s12 = smov (%p27_p1, %s25_s12), 0  ;;  %p135_p3 = pnand %p362_p0, %p134_p2 }
   0x6   : > { %p164_p4 = scmp.lt.s32.totalorder (!%p135_p3), %s409_s9, 1 }
   0x7   : > { %138 = sbr.rel (%p135_p3) target bundleno = 166 (0xa6), region = 24 }
   0xc   : > { %s479_s9 = smov (!%p164_p4, %s409_s9), 1  ;;  %vm251_vm0 = vcmask 1043456   ;;  %vm185_vm1 = vcmask 27648   ;;  %vm187_vm2 = vcmask 3072   ;;  %v419_v10 = vmov 0.0  }
   0xd   : > { %s369_s13 = sshll.u32 %s479_s9, 3  ;;  %s365_s17 = sshll.u32 %s479_s9, 2 }
   0xe   : > { %s171_s16 = scalar_lea.vmem %s471_s0, %s369_s13  ;;  %s176_s20 = scalar_lea.vmem %s472_s1, %s365_s17 }
   0xf   : > { %v189_v0 = vld [vmem:[%s171_s16] sm:$0xff]  ;;  %s180_s23 = scalar_lea.vmem %s473_s2, %s365_s17  ;;  %186 = vst.msk [vmem:[%s176_s20] sm:$0xf] %vm185_vm1, %v419_v10 }
  0x10   : > { %192 = vst [vmem:[#allocation1] ss:$2 sm:$0xff] %v189_v0 }
  0x11   : > { %188 = vst.msk [vmem:[%s180_s23] sm:$0xf] %vm187_vm2, %v419_v10 }
  0x16   : > { %v190_v15 = vld [vmem:[%s176_s20] sm:$0xf] }
  0x17   : > { %v193_v1 = vld.sshfl [vmem:[#allocation1] sm:$0xff pattern:$0x75316420]  ;;  %v194_v2 = vld.sshfl [vmem:[#allocation1 + $0x8] sm:$0xff pattern:$0x75316420] }
  0x18   : > { %197 = vst [vmem:[#allocation1] ss:$2 sm:$0xff] %v189_v0  ;;  %v245_v11 = vld [vmem:[%s180_s23] sm:$0xf] }
  0x1f   : > { %v198_v3 = vld.sshfl [vmem:[#allocation1] sm:$0xff pattern:$0x75316420]  ;;  %v199_v4 = vld.sshfl [vmem:[#allocation1 + $0x8] sm:$0xff pattern:$0x75316420] }
  0x20   : > { %217 = vmatpush.xpose.msra.mxu0 %v198_v3  ;;  %237 = vmatpush.xpose.msra.mxu1 %v199_v4  ;;  %246 = vst [vmem:[#allocation1] ss:$2 sm:$0xff] %v189_v0 }
  0x23   : > { %218 = vmatmul.f32.vlgmr.msra.gmra.mxu0 %v193_v1  ;;  %238 = vmatmul.f32.vlgmr.msra.gmra.mxu1 %v194_v2 }
  0x27   : > { %v247_v5 = vld.sshfl [vmem:[#allocation1] sm:$0xff pattern:$0x75316420]  ;;  %v248_v6 = vld.sshfl [vmem:[#allocation1 + $0x8] sm:$0xff pattern:$0x75316420] }
  0x28   : > { %v252_v7 = vsel %vm251_vm0, %v247_v5, 0.0  ;;  %v253_v8 = vsel %vm251_vm0, %v248_v6, 0.0 }
  0x29   : > { %v254_v9 = vadd.f32 %v253_v8, %v252_v7 }
  0x2b   : > { %255 = vadd.xlane.f32.xlu0 %v254_v9 }
  0x9e   : > { %v256_v12 = vpop.xlane.xlu0 %255 }
  0x9f   : > { %v257_v13 = vadd.f32 %v256_v12, %v245_v11 }
  0xa0   : > { %v219_v14 = vpop.f32.mrf.mxu0  ;;  %v239_v16 = vpop.f32.mrf.mxu1 }
  0xa1   : > { %v240_v17 = vadd.f32 %v239_v16, %v219_v14  ;;  %259 = vst.msk [vmem:[%s180_s23] sm:$0xf] %vm187_vm2, %v257_v13 }
  0xa3   : > { %v242_v18 = vadd.f32 %v240_v17, %v190_v15 }
  0xa5   : > { %244 = vst.msk [vmem:[%s176_s20] sm:$0xf] %vm185_vm1, %v242_v18 }
  0xa6 PF: > { %s13_s11 = sadd.s32 1, %s417_s11   ;;  %s474_s9 = smov %s413_s10 }
  0xa7   : > { %p10_p5 = scmp.ge.s32.totalorder %s13_s11, 4   ;;  %s475_s10 = smov %s477_s12 }
  0xa9   :  { %12 = sbr.rel (!%p10_p5) target bundleno = 2 (0x2), region = 70 }

// kernel: upsample_forward.2
= control target key start
LH: loop header
LB: loop body
LE: loop exit
PB: predicated region body
PF: predicated region fallthrough
CT: control target
= control target key end

     0   :  { %s435_s9 = smov 0   ;;  %s437_s10 = smov 0   ;;  %s471_s0 = inlined_call_operand.vmem [shape: f32[2,4,256], index: 0, kind: input, shape index: {}]   ;;  %s472_s1 = inlined_call_operand.vmem [shape: f32[2,4,4], index: 1, kind: output, shape index: {0}]   ;;  %s473_s2 = inlined_call_operand.vmem [shape: f32[2,4,1], index: 2, kind: output, shape index: {1}]  }
   0x1   :  { %s439_s11 = smov 0  }
   0x2 LB: > { %s25_s12 = sadd.s32 1, %s413_s10  ;;  %p362_p0 = scmp.ge.s32.totalorder %s417_s11, 1  ;;  %s417_s11 = sphi %s439_s11, %s13_s11   ;;  %s413_s10 = sphi %s437_s10, %s475_s10   ;;  %s409_s9 = sphi %s435_s9, %s474_s9  }
   0x3   : > { %p27_p1 = scmp.ge.s32.totalorder %s25_s12, 2  ;;  %p134_p2 = scmp.lt.s32.totalorder %s417_s11, 3 }
   0x5   : > { %s477_s12 = smov (%p27_p1, %s25_s12), 0  ;;  %p135_p3 = pnand %p362_p0, %p134_p2 }
   0x6   : > { %p164_p4 = scmp.lt.s32.totalorder (!%p135_p3), %s409_s9, 1 }
   0x7   : > { %138 = sbr.rel (%p135_p3) target bundleno = 166 (0xa6), region = 24 }
   0xc   : > { %s479_s9 = smov (!%p164_p4, %s409_s9), 1  ;;  %vm251_vm0 = vcmask 1043456   ;;  %vm185_vm1 = vcmask 27648   ;;  %vm187_vm2 = vcmask 3072   ;;  %v419_v10 = vmov 0.0  }
   0xd   : > { %s369_s13 = sshll.u32 %s479_s9, 3  ;;  %s365_s17 = sshll.u32 %s479_s9, 2 }
   0xe   : > { %s171_s16 = scalar_lea.vmem %s471_s0, %s369_s13  ;;  %s176_s20 = scalar_lea.vmem %s472_s1, %s365_s17 }
   0xf   : > { %v189_v0 = vld [vmem:[%s171_s16] sm:$0xff]  ;;  %s180_s23 = scalar_lea.vmem %s473_s2, %s365_s17  ;;  %186 = vst.msk [vmem:[%s176_s20] sm:$0xf] %vm185_vm1, %v419_v10 }
  0x10   : > { %192 = vst [vmem:[#allocation1] ss:$2 sm:$0xff] %v189_v0 }
  0x11   : > { %188 = vst.msk [vmem:[%s180_s23] sm:$0xf] %vm187_vm2, %v419_v10 }
  0x16   : > { %v190_v15 = vld [vmem:[%s176_s20] sm:$0xf] }
  0x17   : > { %v193_v1 = vld.sshfl [vmem:[#allocation1] sm:$0xff pattern:$0x75316420]  ;;  %v194_v2 = vld.sshfl [vmem:[#allocation1 + $0x8] sm:$0xff pattern:$0x75316420] }
  0x18   : > { %197 = vst [vmem:[#allocation1] ss:$2 sm:$0xff] %v189_v0  ;;  %v245_v11 = vld [vmem:[%s180_s23] sm:$0xf] }
  0x1f   : > { %v198_v3 = vld.sshfl [vmem:[#allocation1] sm:$0xff pattern:$0x75316420]  ;;  %v199_v4 = vld.sshfl [vmem:[#allocation1 + $0x8] sm:$0xff pattern:$0x75316420] }
  0x20   : > { %217 = vmatpush.xpose.msra.mxu0 %v198_v3  ;;  %237 = vmatpush.xpose.msra.mxu1 %v199_v4  ;;  %246 = vst [vmem:[#allocation1] ss:$2 sm:$0xff] %v189_v0 }
  0x23   : > { %218 = vmatmul.f32.vlgmr.msra.gmra.mxu0 %v193_v1  ;;  %238 = vmatmul.f32.vlgmr.msra.gmra.mxu1 %v194_v2 }
  0x27   : > { %v247_v5 = vld.sshfl [vmem:[#allocation1] sm:$0xff pattern:$0x75316420]  ;;  %v248_v6 = vld.sshfl [vmem:[#allocation1 + $0x8] sm:$0xff pattern:$0x75316420] }
  0x28   : > { %v252_v7 = vsel %vm251_vm0, %v247_v5, 0.0  ;;  %v253_v8 = vsel %vm251_vm0, %v248_v6, 0.0 }
  0x29   : > { %v254_v9 = vadd.f32 %v253_v8, %v252_v7 }
  0x2b   : > { %255 = vadd.xlane.f32.xlu0 %v254_v9 }
  0x9e   : > { %v256_v12 = vpop.xlane.xlu0 %255 }
  0x9f   : > { %v257_v13 = vadd.f32 %v256_v12, %v245_v11 }
  0xa0   : > { %v219_v14 = vpop.f32.mrf.mxu0  ;;  %v239_v16 = vpop.f32.mrf.mxu1 }
  0xa1   : > { %v240_v17 = vadd.f32 %v239_v16, %v219_v14  ;;  %259 = vst.msk [vmem:[%s180_s23] sm:$0xf] %vm187_vm2, %v257_v13 }
  0xa3   : > { %v242_v18 = vadd.f32 %v240_v17, %v190_v15 }
  0xa5   : > { %244 = vst.msk [vmem:[%s176_s20] sm:$0xf] %vm185_vm1, %v242_v18 }
  0xa6 PF: > { %s13_s11 = sadd.s32 1, %s417_s11   ;;  %s474_s9 = smov %s413_s10 }
  0xa7   : > { %p10_p5 = scmp.ge.s32.totalorder %s13_s11, 4   ;;  %s475_s10 = smov %s477_s12 }
  0xa9   :  { %12 = sbr.rel (!%p10_p5) target bundleno = 2 (0x2), region = 70 }

// kernel: upsample_forward.3
= control target key start
LH: loop header
LB: loop body
LE: loop exit
PB: predicated region body
PF: predicated region fallthrough
CT: control target
= control target key end

     0   :  { %s504_s12 = smov 0   ;;  %s506_s13 = smov 0   ;;  %s557_s0 = inlined_call_operand.vmem [shape: f32[2,4,256], index: 0, kind: input, shape index: {}]   ;;  %s558_s1 = inlined_call_operand.vmem [shape: f32[16,4], index: 1, kind: input, shape index: {}]   ;;  %s559_s2 = inlined_call_operand.vmem [shape: f32[16,1], index: 2, kind: input, shape index: {}]   ;;  %s560_s3 = inlined_call_operand.vmem [shape: f32[2,16,256], index: 3, kind: output, shape index: {}]  }
   0x1   :  { %s508_s14 = smov 0  }
   0x2 LB: > { %s25_s15 = sadd.s32 1, %s474_s13  ;;  %p411_p0 = scmp.ge.s32.totalorder %s478_s14, 1  ;;  %s478_s14 = sphi %s508_s14, %s13_s14   ;;  %s474_s13 = sphi %s506_s13, %s562_s13   ;;  %s470_s12 = sphi %s504_s12, %s561_s12  }
   0x3   : > { %p27_p1 = scmp.ge.s32.totalorder %s25_s15, 2  ;;  %p158_p2 = scmp.lt.s32.totalorder %s478_s14, 3 }
   0x5   : > { %s564_s15 = smov (%p27_p1, %s25_s15), 0  ;;  %p159_p3 = pnand %p411_p0, %p158_p2 }
   0x6   : > { %p191_p4 = scmp.lt.s32.totalorder (!%p159_p3), %s470_s12, 1 }
   0x7   : > { %162 = sbr.rel (%p159_p3) target bundleno = 159 (0x9f), region = 32 }
   0xc   : > { %v210_v0 = vld [vmem:[%s558_s1] sm:$0xff]  ;;  %v480_v1 = vmov 1   ;;  %v481_v2 = vmov 0   ;;  %v482_v3 = vmov 2   ;;  %v211_v4 = vld [vmem:[%s558_s1 + $0x8] sm:$0xff]  ;;  %v483_v5 = vmov 3  }
   0xd   : > { %449 = vset.pattern.permute.xlu1 %v480_v1  ;;  %448 = vset.pattern.permute.xlu0 %v481_v2  ;;  %v300_v6 = vld [vmem:[%s559_s2] sm:$0xff]  ;;  %v301_v7 = vld [vmem:[%s559_s2 + $0x8] sm:$0xff]  ;;  %s566_s12 = smov (!%p191_p4, %s470_s12), 1 }
   0xe   : > { %235 = vperm.xlu1 %449, %v210_v0   ;;  %215 = vperm.xlu0 %448, %v210_v0   ;;  %s418_s24 = sshll.u32 %s566_s12, 3  ;;  %s419_s28 = sshll.u32 %s566_s12, 5 }
   0xf   : > { %450 = vset.pattern.permute.xlu2 %v482_v3  ;;  %s198_s27 = scalar_lea.vmem %s557_s0, %s418_s24  ;;  %s208_s4 = scalar_lea.vmem %s560_s3, %s419_s28 }
  0x10   : > { %257 = vperm.xlu2 %450, %v210_v0   ;;  %v212_v8 = vld [vmem:[%s198_s27] sm:$0xff] }
  0x11   : > { %v242_v12 = vperm.slane %v212_v8, 1  ;;  %v243_v13 = vperm.slane %v212_v8, 5  ;;  %v224_v14 = vperm.slane %v212_v8, 0  ;;  %v225_v15 = vperm.slane %v212_v8, 4 }
  0x12   : > { %v264_v16 = vperm.slane %v212_v8, 2  ;;  %v265_v17 = vperm.slane %v212_v8, 6  ;;  %v286_v26 = vperm.slane %v212_v8, 3  ;;  %v287_v27 = vperm.slane %v212_v8, 7 }
  0x13   : > { %v246_v18 = vperm.slane %v242_v12, 1  ;;  %v247_v19 = vperm.slane %v243_v13, 1  ;;  %v228_v20 = vperm.slane %v224_v14, 0  ;;  %v229_v21 = vperm.slane %v225_v15, 0 }
  0x14   : > { %v268_v24 = vperm.slane %v264_v16, 2  ;;  %v269_v25 = vperm.slane %v265_v17, 2  ;;  %v290_v37 = vperm.slane %v286_v26, 3  ;;  %v291_v38 = vperm.slane %v287_v27, 3 }
  0x16   : > { %239 = vperm.xlu1 %449, %v211_v4   ;;  %220 = vperm.xlu0 %448, %v211_v4  }
  0x18   : > { %261 = vperm.xlu2 %450, %v211_v4  }
  0x1e   : > { %452 = vset.pattern.permute.xlu1 %v483_v5  ;;  %451 = vset.pattern.permute.xlu0 %v483_v5 }
  0x1f   : > { %283 = vperm.xlu1 %452, %v211_v4   ;;  %279 = vperm.xlu0 %451, %v210_v0  }
  0x20   : > { %453 = vset.pattern.permute.xlu2 %v481_v2 }
  0x21   : > { %304 = vperm.xlu2 %453, %v300_v6  }
  0x27   : > { %454 = vset.pattern.permute.xlu1 %v481_v2  ;;  %455 = vset.pattern.permute.xlu0 %v481_v2 }
  0x28   : > { %309 = vperm.xlu1 %454, %v301_v7  }
  0x6a   : > { %v258_v11 = vpop.permute.xlu2 %257 }
  0x6b   : > { %v270_v33 = vmul.f32 %v268_v24, %v258_v11  ;;  %v271_v34 = vmul.f32 %v269_v25, %v258_v11 }
  0x72   : > { %v262_v32 = vpop.permute.xlu2 %261 }
  0x73   : > { %v272_v51 = vmul.f32 %v268_v24, %v262_v32  ;;  %v273_v52 = vmul.f32 %v269_v25, %v262_v32 }
  0x7b   : > { %v305_v53 = vpop.permute.xlu2 %304 }
  0x80   : > { %v236_v9 = vpop.permute.xlu1 %235  ;;  %v216_v10 = vpop.permute.xlu0 %215 }
  0x81   : > { %v248_v28 = vmul.f32 %v246_v18, %v236_v9  ;;  %v249_v29 = vmul.f32 %v247_v19, %v236_v9  ;;  %v230_v30 = vmul.f32 %v228_v20, %v216_v10  ;;  %v231_v31 = vmul.f32 %v229_v21, %v216_v10 }
  0x83   : > { %v252_v35 = vadd.f32 %v248_v28, %v230_v30  ;;  %v253_v36 = vadd.f32 %v249_v29, %v231_v31 }
  0x85   : > { %v274_v45 = vadd.f32 %v270_v33, %v252_v35  ;;  %v275_v46 = vadd.f32 %v271_v34, %v253_v36 }
  0x88   : > { %v240_v22 = vpop.permute.xlu1 %239  ;;  %v221_v23 = vpop.permute.xlu0 %220 }
  0x89   : > { %v250_v39 = vmul.f32 %v246_v18, %v240_v22  ;;  %v251_v40 = vmul.f32 %v247_v19, %v240_v22  ;;  %v232_v41 = vmul.f32 %v228_v20, %v221_v23  ;;  %v233_v42 = vmul.f32 %v229_v21, %v221_v23 }
  0x8b   : > { %v254_v49 = vadd.f32 %v250_v39, %v232_v41  ;;  %v255_v50 = vadd.f32 %v251_v40, %v233_v42 }
  0x8d   : > { %v276_v60 = vadd.f32 %v272_v51, %v254_v49  ;;  %v277_v61 = vadd.f32 %v273_v52, %v255_v50 }
  0x91   : > { %v284_v43 = vpop.permute.xlu1 %283  ;;  %v280_v44 = vpop.permute.xlu0 %279 }
  0x92   : > { %v292_v47 = vmul.f32 %v290_v37, %v280_v44  ;;  %v293_v48 = vmul.f32 %v291_v38, %v280_v44  ;;  %v294_v56 = vmul.f32 %v290_v37, %v284_v43  ;;  %v295_v57 = vmul.f32 %v291_v38, %v284_v43 }
  0x94   : > { %v296_v54 = vadd.f32 %v292_v47, %v274_v45  ;;  %v297_v55 = vadd.f32 %v293_v48, %v275_v46  ;;  %v298_v62 = vadd.f32 %v294_v56, %v276_v60  ;;  %v299_v63 = vadd.f32 %v295_v57, %v277_v61 }
  0x96   : > { %v312_v58 = vadd.f32 %v305_v53, %v296_v54  ;;  %v313_v59 = vadd.f32 %v305_v53, %v297_v55 }
  0x98   : > { %316 = vst [vmem:[%s208_s4] sm:$0xff] %v312_v58 }
  0x99   : > { %317 = vst [vmem:[%s208_s4 + $0x8] sm:$0xff] %v313_v59 }
  0x9a   : > { %v310_v0 = vpop.permute.xlu1 %309 }
  0x9b   : > { %v314_v1 = vadd.f32 %v310_v0, %v298_v62  ;;  %v315_v2 = vadd.f32 %v310_v0, %v299_v63 }
  0x9d   : > { %318 = vst [vmem:[%s208_s4 + $0x10] sm:$0xff] %v314_v1 }
  0x9e   : > { %319 = vst [vmem:[%s208_s4 + $0x18] sm:$0xff] %v315_v2 }
  0x9f PF: > { %s13_s14 = sadd.s32 1, %s478_s14   ;;  %s561_s12 = smov %s474_s13 }
  0xa0   : > { %p10_p5 = scmp.ge.s32.totalorder %s13_s14, 4   ;;  %s562_s13 = smov %s564_s15 }
  0xa2   :  { %12 = sbr.rel (!%p10_p5) target bundleno = 2 (0x2), region = 62 }

</bundles_post_ra>
